<compile_context>
chip_gen: v7x
topology: tpu7x:2x2x1
jax: 0.10.0
libtpu: 0.0.40
codegen_flags: <defaults>
</compile_context>

<pallas_src>
import jax
import jax.numpy as jnp
from jax.experimental import pallas as pl
from jax.experimental.pallas import tpu as pltpu


def _squeezed_shape(shape):
    """torch.squeeze(dim=3) then torch.squeeze(dim=2) shape bookkeeping."""
    out = list(shape)
    if len(out) > 3 and out[3] == 1:
        out.pop(3)
    if len(out) > 2 and out[2] == 1:
        out.pop(2)
    return tuple(out)


def squeeze_forward(x):
    """Primary path: metadata-only squeeze (zero-cost reshape/bitcast)."""
    assert x.ndim == 4, "Squeeze module expects a 4-D NCHW tensor"
    return x.reshape(_squeezed_shape(x.shape))


# ----------------------------------------------------------------------------
# Optional Pallas copy path (fusion anchor).  Not needed for correctness or
# performance of Squeeze itself — kept per the "if a Pallas copy must be kept"
# branch of the review.
# ----------------------------------------------------------------------------

def _copy_kernel(x_ref, o_ref):
    o_ref[...] = x_ref[...]


def _pick_tile(extent, multiple, cap):
    """Largest tile <= cap that divides `extent` and is a multiple of
    `multiple`; falls back to the full extent (always a legal block dim)."""
    if extent % multiple == 0:
        t = min(extent, cap)
        while extent % t != 0 or t % multiple != 0:
            t -= multiple
        return t
    return extent


def squeeze_forward_pallas(x):
    """Same semantics as squeeze_forward, routed through a tiled, aliased
    Pallas identity copy."""
    assert x.ndim == 4, "Squeeze module expects a 4-D NCHW tensor"
    out_shape = _squeezed_shape(x.shape)

    n = x.shape[0]
    rest = 1
    for d in x.shape[1:]:
        rest *= d
    # Contiguous NCHW -> (n, rest) is a pure view; rest (=C*H*W) is the
    # lane-dense axis.
    x2d = x.reshape(n, rest)

    # Tile caps: (256, 2048) f32 block = 2 MiB per buffer; with double
    # buffering of input + aliased output that stays far below v5e's 16 MiB
    # scoped-VMEM default and v7x's 64 MiB physical VMEM.
    tn = _pick_tile(rest, 128, 2048)   # lane dim: multiple of 128 or full
    tm = _pick_tile(n, 8, 256)         # sublane dim: multiple of 8 or full

    grid = (pl.cdiv(n, tm), pl.cdiv(rest, tn))

    out2d = pl.pallas_call(
        _copy_kernel,
        out_shape=jax.ShapeDtypeStruct((n, rest), x.dtype),
        grid=grid,
        in_specs=[pl.BlockSpec((tm, tn), lambda i, j: (i, j))],
        out_specs=pl.BlockSpec((tm, tn), lambda i, j: (i, j)),
        # Output aliases the input buffer: no second full-size HBM array.
        input_output_aliases={0: 0},
        # Both grid axes are independent -> shard across TCs (v7x megacore).
        compiler_params=pltpu.CompilerParams(
            dimension_semantics=("parallel", "parallel")),
    )(x2d)

    return out2d.reshape(out_shape)


def _torch_squeeze_ref(x):
    """Plain-JAX reference with torch.squeeze(dim=...) semantics."""
    y = jnp.squeeze(x, axis=3) if x.shape[3] == 1 else x
    y = jnp.squeeze(y, axis=2) if y.shape[2] == 1 else y
    return y


if __name__ == "__main__":
    key = jax.random.PRNGKey(0)
    k1, k2 = jax.random.split(key)

    # Case 1: generic NCHW input (nothing to squeeze — shape preserved).
    x1 = jax.random.normal(k1, (2, 4, 16, 16), dtype=jnp.float32)
    # Case 2: typical post-global-pool input (N, C, 1, 1) -> (N, C).
    x2 = jax.random.normal(k2, (2, 4, 1, 1), dtype=jnp.float32)

    for x in (x1, x2):
        ref = _torch_squeeze_ref(x)

        # Primary (metadata-only) path.
        out_meta = jax.block_until_ready(squeeze_forward(x))
        assert out_meta.shape == ref.shape, (out_meta.shape, ref.shape)
        assert jnp.allclose(out_meta, ref), "metadata path mismatch"

        # Optional Pallas copy path.
        out_pallas = jax.block_until_ready(squeeze_forward_pallas(x))
        assert out_pallas.shape == ref.shape, (out_pallas.shape, ref.shape)
        assert jnp.allclose(out_pallas, ref), "pallas path mismatch"

    print("KERNEL_OK")
</pallas_src>

<mosaic_0001>
module attributes {stable_mosaic.version = 11 : i64} {
  func.func @_copy_kernel(%arg0: i32, %arg1: i32, %arg2: memref<2x1024xf32, #tpu.memory_space<vmem>>, %arg3: memref<2x1024xf32, #tpu.memory_space<vmem>>) attributes {dimension_semantics = [#tpu.dimension_semantics<parallel>, #tpu.dimension_semantics<parallel>], iteration_bounds = array<i64: 1, 1>, scalar_prefetch = 0 : i64, scratch_operands = 0 : i64, tpu.core_type = #tpu.core_type<tc>, window_params = [{transform_indices = @transform_0, window_bounds = array<i64: 2, 1024>}, {transform_indices = @transform_1, window_bounds = array<i64: 2, 1024>}]} {
    %c0 = arith.constant 0 : index
    %c0_0 = arith.constant 0 : index
    %0 = vector.load %arg2[%c0, %c0_0] : memref<2x1024xf32, #tpu.memory_space<vmem>>, vector<2x1024xf32>
    %c0_1 = arith.constant 0 : index
    %c0_2 = arith.constant 0 : index
    %1 = vector.load %arg3[%c0_1, %c0_2] : memref<2x1024xf32, #tpu.memory_space<vmem>>, vector<2x1024xf32>
    tpu.vector_store %arg3[%c0_1, %c0_2], %0 {strides = array<i32>} : memref<2x1024xf32, #tpu.memory_space<vmem>>, vector<2x1024xf32>,
    return
  }
  func.func @transform_0(%arg0: i32, %arg1: i32) -> (i32, i32) {
    %c0_i32 = arith.constant 0 : i32
    return %arg0, %arg1 : i32, i32
  }
  func.func @transform_1(%arg0: i32, %arg1: i32) -> (i32, i32) {
    %c0_i32 = arith.constant 0 : i32
    return %arg0, %arg1 : i32, i32
  }
}

</mosaic_0001>

<bundles_post_ra>
// kernel: tpu_custom_call.1
= control target key start
LH: loop header
LB: loop body
LE: loop exit
PB: predicated region body
PF: predicated region fallthrough
CT: control target
= control target key end

     0   :  { %6 = vsyncpa [#allocation3], 0  ;;  %s126_s0 = inlined_call_operand.hbm [shape: f32[2,1024], index: 0, kind: input, shape index: {}, may-alias: {0,1}]   ;;  %s127_s1 = inlined_call_operand.hbm [shape: f32[2,1024], index: 1, kind: output, shape index: {}, may-alias: {0,1}]  }
   0x1   :  { %7 = vsyncpa [#allocation4], 0  ;;  %s90_s6 = smov [#allocation2]   ;;  %s42_s10 = scalar_lea.hbm %s126_s0, 256 }
   0x2   :  { %s14_s7 = sshll.u32 %s90_s6, 4  ;;  %p43_p0 = scmp.ne.s32.totalorder %s126_s0, %s42_s10  ;;  %s15_s7 = int_to_ptr.vmem [resolvable:$true] %s14_s7 }
   0x3   :  { %p46_p1 = scmp.lt.u32.totalorder %s42_s10, %s126_s0 }
   0x5   :  { %p48_p2 = pnand %p46_p1, %p43_p0 }
   0x7   :  { %51 = shalt.err (!%p48_p2)
}
   0x8   :  { %s52_s15 = scalar_lea.vmem %s15_s7, 256  ;;  %p57_p4 = scmp.lt.s32.totalorder %s15_s7, %s15_s7 }
   0x9   :  { %p53_p3 = scmp.ne.s32.totalorder %s15_s7, %s52_s15  ;;  %p58_p5 = scmp.lt.s32.totalorder %s52_s15, %s52_s15 }
   0xb   :  { %p59_p6 = por %p58_p5, %p57_p4 }
   0xd   :  { %p60_p7 = pnand %p59_p6, %p53_p3 }
   0xf   :  { %63 = shalt.err (!%p60_p7)
}
  0x10   :  { %17 = dma.hbm_to_vmem [thread:$0]  %s126_s0, 256, %s15_s7, [#allocation3]  }
  0x11   :  { %86 = dma.done.wait [#allocation3], 256  }
  0x12   :  { %87 = vsyncadd [#allocation3], 4294967040  ;;  %s91_s18 = smov [#allocation5]   ;;  %v21_v0 = vld [vmem:[#allocation2] sm:$0xff]  ;;  %v22_v1 = vld [vmem:[#allocation2 + $0x8] sm:$0xff] }
  0x13   :  { %s31_s19 = sshll.u32 %s91_s18, 4  ;;  %23 = vst [vmem:[#allocation5] sm:$0xff] %v21_v0  ;;  %24 = vst [vmem:[#allocation5 + $0x8] sm:$0xff] %v22_v1  ;;  %s32_s19 = int_to_ptr.vmem [resolvable:$true] %s31_s19 }
  0x14   :  { %s64_s20 = scalar_lea.vmem %s32_s19, 256  ;;  %p69_p9 = scmp.lt.s32.totalorder %s32_s19, %s32_s19 }
  0x15   :  { %p65_p8 = scmp.ne.s32.totalorder %s32_s19, %s64_s20  ;;  %p70_p10 = scmp.lt.s32.totalorder %s64_s20, %s64_s20 }
  0x17   :  { %p71_p11 = por %p70_p10, %p69_p9 }
  0x19   :  { %p72_p12 = pnand %p71_p11, %p65_p8 }
  0x1b   :  { %75 = shalt.err (!%p72_p12)
}
  0x1c   :  { %s76_s0 = scalar_lea.hbm %s127_s1, 256 }
  0x1d   :  { %p77_p13 = scmp.ne.s32.totalorder %s127_s1, %s76_s0  ;;  %p80_p0 = scmp.lt.u32.totalorder %s76_s0, %s127_s1 }
  0x1f   :  { %p82_p1 = pnand %p80_p0, %p77_p13 }
  0x21   :  { %85 = shalt.err (!%p82_p1)
}
  0x22   :  { %34 = dma.vmem_to_hbm [thread:$0]  %s32_s19, 256, %s127_s1, [#allocation4]  }
  0x23   :  { %88 = dma.done.wait [#allocation4], 256  }
  0x24   :  { %89 = vsyncadd [#allocation4], 4294967040 }
  0x25   :  { %38 = vsyncpa [#allocation3], 1 }
  0x26   :  { %39 = vsyncpa [#allocation4], 1 }

</bundles_post_ra>
